<compile_context>
chip_gen: v6e
topology: v6e:2x2x1
jax: 0.10.0
libtpu: 0.0.40
codegen_flags: <defaults>
</compile_context>

<pallas_src>
import functools

import jax
import jax.numpy as jnp
import numpy as np
from jax import lax
from jax.experimental import pallas as pl
from jax.experimental.pallas import tpu as pltpu


def _fmp_block_kernel(patches_ref, wbd_ref, rs_ref, s2_ref, o_ref, *, H, W, C, outH):
    # patches_ref: (1, H, W*K1)     bf16  im2col patches for this batch; last col of each tap group = 1
    # wbd_ref    : (W*K1, W*C)      bf16  block-diagonal conv weights (bias row folded in)
    # rs_ref     : (1, outH, W*C)   i32   row-window starts tiled onto the lane-packed (w, c) axis
    # s2_ref     : (1, W*C, PAD)    f32   one-hot column-select matrix (PAD = outW*C rounded up to 128)
    # o_ref      : (1, outH, PAD)   f32
    WC = W * C
    neg = jnp.float32(-jnp.inf)

    # ---- 3x3 conv (stride 1, pad 1): one lane-dense MXU matmul -> (H, W*C) ----
    conv = jnp.dot(patches_ref[0], wbd_ref[...],
                   preferred_element_type=jnp.float32)             # (H, W*C) f32

    # ---- rows: pairwise max over (h, h+1) via XLU sublane roll ----
    # rolled row h holds conv row h+1 (row H-1 wraps to row 0, but rs <= H-2 so it is never selected).
    rowmax = jnp.maximum(conv, pltpu.roll(conv, H - 1, 0))          # (H, W*C)

    # ---- row select: short static loop over h, small (outH, W*C) working set (no big spills) ----
    rs = rs_ref[0]                                                  # (outH, W*C) i32
    acc = jnp.full((outH, WC), neg, jnp.float32)
    for h in range(H):
        acc = jnp.maximum(acc, jnp.where(rs == h, rowmax[h:h + 1, :], neg))

    # ---- cols: pairwise max over (w, w+1) via XLU lane roll by C ----
    # rolled lane (w, c) holds value at (w+1, c); w = W-1 wraps but cs <= W-2 so never selected.
    colmax = jnp.maximum(acc, pltpu.roll(acc, WC - C, 1))           # (outH, W*C)

    # ---- col select: one MXU matmul into a lane-dense 128-wide padded output ----
    o_ref[0] = jnp.dot(colmax, s2_ref[0], preferred_element_type=jnp.float32)


def fmp_block(x_nhwc, w_hwio, bias, row_starts, col_starts):
    """Conv2d(3x3, pad 1) + fractional max pool (kernel 2) with given per-(n, c) window starts.

    x_nhwc: (N, H, W, Cin); w_hwio: (3, 3, Cin, Cout); bias: (Cout,)
    row_starts: (N, outH, Cout) int32; col_starts: (N, outW, Cout) int32.
    Returns (N, outH, outW, Cout) float32.
    """
    N, H, W, Cin = x_nhwc.shape
    Cout = w_hwio.shape[-1]
    outH, outW = row_starts.shape[1], col_starts.shape[1]
    K1 = 9 * Cin + 1
    WC = W * Cout
    OWC = outW * Cout
    PAD = max(128, ((OWC + 127) // 128) * 128)    # lane-dense padded output width

    # --- im2col in the wrapper (layout plumbing), laid out (n, h) x (w, tap) for block-diag matmul ---
    xp = jnp.pad(x_nhwc, ((0, 0), (1, 1), (1, 1), (0, 0)))
    taps = [xp[:, kh:kh + H, kw:kw + W, :] for kh in range(3) for kw in range(3)]
    patches = jnp.stack(taps, axis=3).reshape(N, H, W, 9 * Cin)
    patches = jnp.concatenate(
        [patches, jnp.ones((N, H, W, 1), patches.dtype)], axis=-1)       # bias column -> (N,H,W,K1)
    patches = patches.reshape(N, H, W * K1).astype(jnp.bfloat16)

    # --- block-diagonal weight: wbd[w*K1 + k, w'*Cout + c] = (w == w') * w2[k, c] ---
    w2 = jnp.concatenate(
        [w_hwio.reshape(9 * Cin, Cout), bias.reshape(1, Cout).astype(w_hwio.dtype)], axis=0)
    eye_w = jnp.eye(W, dtype=w2.dtype)
    wbd = (eye_w[:, None, :, None] * w2[None, :, None, :]).reshape(W * K1, WC).astype(jnp.bfloat16)

    # --- row starts tiled onto the lane-packed (w, c) axis ---
    rs_lane = jnp.tile(row_starts[:, :, None, :], (1, 1, W, 1)).reshape(N, outH, WC).astype(jnp.int32)

    # --- one-hot column selection matrices, padded to 128 output lanes ---
    # s2[n, w*C + c, ow*C + c'] = (c == c') * (w == cs[n, ow, c'])
    w_onehot = (jnp.arange(W)[None, :, None, None] == col_starts[:, None, :, :]).astype(jnp.float32)
    eye_c = jnp.eye(Cout, dtype=jnp.float32)
    s2 = (w_onehot[:, :, None, :, :] * eye_c[None, None, :, None, :]).reshape(N, WC, OWC)
    s2 = jnp.pad(s2, ((0, 0), (0, 0), (0, PAD - OWC)))

    kernel = functools.partial(_fmp_block_kernel, H=H, W=W, C=Cout, outH=outH)

    flops = 2 * N * H * (W * K1) * WC + 2 * N * outH * WC * PAD
    bytes_accessed = (patches.size * 2 + wbd.size * 2 + rs_lane.size * 4
                      + s2.size * 4 + N * outH * PAD * 4)

    out = pl.pallas_call(
        kernel,
        out_shape=jax.ShapeDtypeStruct((N, outH, PAD), jnp.float32),
        grid=(N,),
        in_specs=[
            pl.BlockSpec((1, H, W * K1), lambda n: (n, 0, 0)),
            pl.BlockSpec((W * K1, WC), lambda n: (0, 0)),       # weight resident across batch steps
            pl.BlockSpec((1, outH, WC), lambda n: (n, 0, 0)),
            pl.BlockSpec((1, WC, PAD), lambda n: (n, 0, 0)),
        ],
        out_specs=pl.BlockSpec((1, outH, PAD), lambda n: (n, 0, 0)),
        compiler_params=pltpu.CompilerParams(dimension_semantics=("parallel",)),
        cost_estimate=pl.CostEstimate(flops=flops, transcendentals=0,
                                      bytes_accessed=bytes_accessed),
    )(patches, wbd, rs_lane, s2)

    return out[..., :OWC].reshape(N, outH, outW, Cout)


def generate_intervals(sample, input_size, output_size, pool_size):
    """ATen FractionalMaxPool2d generate_intervals: window start index per output position."""
    last = jnp.full(sample.shape + (1,), input_size - pool_size, jnp.int32)
    if output_size == 1:                 # guard divide-by-zero for output_size == 1
        return last
    alpha = float(input_size - pool_size) / float(output_size - 1)
    i = jnp.arange(output_size - 1, dtype=jnp.float32)
    seq = (jnp.floor((i + sample[..., None]) * alpha)
           - jnp.floor(sample[..., None] * alpha)).astype(jnp.int32)
    return jnp.concatenate([seq, last], axis=-1)


if __name__ == "__main__":
    N, Cin, Cout, H, W = 2, 4, 8, 16, 16
    output_ratio = 0.8
    outH, outW = int(H * output_ratio), int(W * output_ratio)    # 12, 12

    key = jax.random.PRNGKey(0)
    kx, kw, kb, ks = jax.random.split(key, 4)
    x_nchw = jax.random.normal(kx, (N, Cin, H, W), jnp.float32)           # PyTorch NCHW input
    w_oihw = jax.random.normal(kw, (Cout, Cin, 3, 3), jnp.float32) * 0.1  # PyTorch OIHW weight
    b = jax.random.normal(kb, (Cout,), jnp.float32) * 0.1

    x_nhwc = jnp.transpose(x_nchw, (0, 2, 3, 1))
    w_hwio = jnp.transpose(w_oihw, (2, 3, 1, 0))

    # FractionalMaxPool2d draws one uniform sample per (batch, channel, spatial-dim).
    # TODO(synk): PyTorch's internal RNG stream cannot be bit-matched; samples come from jax.random.
    samples = jax.random.uniform(ks, (N, Cout, 2), jnp.float32)
    col_starts = jnp.transpose(generate_intervals(samples[..., 0], W, outW, 2), (0, 2, 1))  # (N,outW,C)
    row_starts = jnp.transpose(generate_intervals(samples[..., 1], H, outH, 2), (0, 2, 1))  # (N,outH,C)

    # kernel_size=2 pooling assumption: window starts must never hit the last row/column.
    assert int(np.max(np.asarray(row_starts))) <= H - 2
    assert int(np.max(np.asarray(col_starts))) <= W - 2

    out = jax.block_until_ready(fmp_block(x_nhwc, w_hwio, b, row_starts, col_starts))

    # Independent reference: XLA f32 conv + numpy fractional max pool with the same window starts.
    conv_ref = lax.conv_general_dilated(
        x_nhwc, w_hwio, (1, 1), "SAME", dimension_numbers=("NHWC", "HWIO", "NHWC")) + b
    conv_np = np.asarray(conv_ref)
    rs_np, cs_np = np.asarray(row_starts), np.asarray(col_starts)
    ref = np.zeros((N, outH, outW, Cout), np.float32)
    for n in range(N):
        for c in range(Cout):
            for oh in range(outH):
                for ow in range(outW):
                    h0, w0 = rs_np[n, oh, c], cs_np[n, ow, c]
                    ref[n, oh, ow, c] = conv_np[n, h0:h0 + 2, w0:w0 + 2, c].max()
    # bf16 conv-matmul operands (f32 accumulation) -> ~1e-3-level differences vs. the f32 reference.
    np.testing.assert_allclose(np.asarray(out), ref, rtol=1e-2, atol=1e-2)

    print("KERNEL_OK")
</pallas_src>

<mosaic_0001>
module attributes {stable_mosaic.version = 11 : i64} {
  func.func @_fmp_block_kernel(%arg0: i32, %arg1: memref<1x16x592xbf16, #tpu.memory_space<vmem>>, %arg2: memref<592x128xbf16, #tpu.memory_space<vmem>>, %arg3: memref<1x12x128xi32, #tpu.memory_space<vmem>>, %arg4: memref<1x128x128xf32, #tpu.memory_space<vmem>>, %arg5: memref<1x12x128xf32, #tpu.memory_space<vmem>>) attributes {dimension_semantics = [#tpu.dimension_semantics<parallel>], iteration_bounds = array<i64: 2>, scalar_prefetch = 0 : i64, scratch_operands = 0 : i64, tpu.core_type = #tpu.core_type<tc>, window_params = [{transform_indices = @transform_0, window_bounds = array<i64: 1, 16, 592>}, {pipeline_mode = #tpu.pipeline_mode<synchronous>, transform_indices = @transform_1, window_bounds = array<i64: 592, 128>}, {transform_indices = @transform_2, window_bounds = array<i64: 1, 12, 128>}, {transform_indices = @transform_3, window_bounds = array<i64: 1, 128, 128>}, {transform_indices = @transform_4, window_bounds = array<i64: 1, 12, 128>}]} {
    %c0 = arith.constant 0 : index
    %c0_0 = arith.constant 0 : index
    %c0_1 = arith.constant 0 : index
    %0 = vector.load %arg1[%c0, %c0_0, %c0_1] : memref<1x16x592xbf16, #tpu.memory_space<vmem>>, vector<1x16x592xbf16>
    %1 = vector.shape_cast %0 : vector<1x16x592xbf16> to vector<16x592xbf16>
    %c0_2 = arith.constant 0 : index
    %c0_3 = arith.constant 0 : index
    %2 = vector.load %arg2[%c0_2, %c0_3] : memref<592x128xbf16, #tpu.memory_space<vmem>>, vector<592x128xbf16>
    %cst = arith.constant dense<0.000000e+00> : vector<16x128xf32>
    %3 = tpu.matmul %1, %2, %cst {dimension_numbers = #tpu.dot_dimension_numbers<[1], [0], [0], [1], [0, 0, 1, 1], [], []>} : vector<16x592xbf16>, vector<592x128xbf16>, vector<16x128xf32> -> vector<16x128xf32>
    %c15_i32 = arith.constant 15 : i32
    %4 = tpu.dynamic_rotate %3 by %c15_i32 dim 0 : vector<16x128xf32>, i32 -> vector<16x128xf32>
    %5 = arith.maximumf %3, %4 : vector<16x128xf32>
    %c0_4 = arith.constant 0 : index
    %c0_5 = arith.constant 0 : index
    %c0_6 = arith.constant 0 : index
    %6 = vector.load %arg3[%c0_4, %c0_5, %c0_6] : memref<1x12x128xi32, #tpu.memory_space<vmem>>, vector<1x12x128xi32>
    %7 = vector.shape_cast %6 : vector<1x12x128xi32> to vector<12x128xi32>
    %cst_7 = arith.constant 0xFF800000 : f32
    %8 = vector.broadcast %cst_7 : f32 to vector<12x128xf32>
    %c0_i32 = arith.constant 0 : i32
    %9 = vector.broadcast %c0_i32 : i32 to vector<12x128xi32>
    %10 = arith.cmpi eq, %7, %9 : vector<12x128xi32>
    %11 = vector.extract_strided_slice %5 {offsets = [0, 0], sizes = [1, 128], strides = [1, 1]} : vector<16x128xf32> to vector<1x128xf32>
    %cst_8 = arith.constant 0xFF800000 : f32
    %12 = vector.shape_cast %11 : vector<1x128xf32> to vector<1x128xf32>
    %13 = vector.broadcast %12 : vector<1x128xf32> to vector<12x128xf32>
    %14 = vector.broadcast %cst_8 : f32 to vector<12x128xf32>
    %15 = arith.select %10, %13, %14 : vector<12x128xi1>, vector<12x128xf32>
    %16 = arith.maximumf %8, %15 : vector<12x128xf32>
    %c1_i32 = arith.constant 1 : i32
    %17 = vector.broadcast %c1_i32 : i32 to vector<12x128xi32>
    %18 = arith.cmpi eq, %7, %17 : vector<12x128xi32>
    %19 = vector.extract_strided_slice %5 {offsets = [1, 0], sizes = [1, 128], strides = [1, 1]} : vector<16x128xf32> to vector<1x128xf32>
    %cst_9 = arith.constant 0xFF800000 : f32
    %20 = vector.shape_cast %19 : vector<1x128xf32> to vector<1x128xf32>
    %21 = vector.broadcast %20 : vector<1x128xf32> to vector<12x128xf32>
    %22 = vector.broadcast %cst_9 : f32 to vector<12x128xf32>
    %23 = arith.select %18, %21, %22 : vector<12x128xi1>, vector<12x128xf32>
    %24 = arith.maximumf %16, %23 : vector<12x128xf32>
    %c2_i32 = arith.constant 2 : i32
    %25 = vector.broadcast %c2_i32 : i32 to vector<12x128xi32>
    %26 = arith.cmpi eq, %7, %25 : vector<12x128xi32>
    %27 = vector.extract_strided_slice %5 {offsets = [2, 0], sizes = [1, 128], strides = [1, 1]} : vector<16x128xf32> to vector<1x128xf32>
    %cst_10 = arith.constant 0xFF800000 : f32
    %28 = vector.shape_cast %27 : vector<1x128xf32> to vector<1x128xf32>
    %29 = vector.broadcast %28 : vector<1x128xf32> to vector<12x128xf32>
    %30 = vector.broadcast %cst_10 : f32 to vector<12x128xf32>
    %31 = arith.select %26, %29, %30 : vector<12x128xi1>, vector<12x128xf32>
    %32 = arith.maximumf %24, %31 : vector<12x128xf32>
    %c3_i32 = arith.constant 3 : i32
    %33 = vector.broadcast %c3_i32 : i32 to vector<12x128xi32>
    %34 = arith.cmpi eq, %7, %33 : vector<12x128xi32>
    %35 = vector.extract_strided_slice %5 {offsets = [3, 0], sizes = [1, 128], strides = [1, 1]} : vector<16x128xf32> to vector<1x128xf32>
    %cst_11 = arith.constant 0xFF800000 : f32
    %36 = vector.shape_cast %35 : vector<1x128xf32> to vector<1x128xf32>
    %37 = vector.broadcast %36 : vector<1x128xf32> to vector<12x128xf32>
    %38 = vector.broadcast %cst_11 : f32 to vector<12x128xf32>
    %39 = arith.select %34, %37, %38 : vector<12x128xi1>, vector<12x128xf32>
    %40 = arith.maximumf %32, %39 : vector<12x128xf32>
    %c4_i32 = arith.constant 4 : i32
    %41 = vector.broadcast %c4_i32 : i32 to vector<12x128xi32>
    %42 = arith.cmpi eq, %7, %41 : vector<12x128xi32>
    %43 = vector.extract_strided_slice %5 {offsets = [4, 0], sizes = [1, 128], strides = [1, 1]} : vector<16x128xf32> to vector<1x128xf32>
    %cst_12 = arith.constant 0xFF800000 : f32
    %44 = vector.shape_cast %43 : vector<1x128xf32> to vector<1x128xf32>
    %45 = vector.broadcast %44 : vector<1x128xf32> to vector<12x128xf32>
    %46 = vector.broadcast %cst_12 : f32 to vector<12x128xf32>
    %47 = arith.select %42, %45, %46 : vector<12x128xi1>, vector<12x128xf32>
    %48 = arith.maximumf %40, %47 : vector<12x128xf32>
    %c5_i32 = arith.constant 5 : i32
    %49 = vector.broadcast %c5_i32 : i32 to vector<12x128xi32>
    %50 = arith.cmpi eq, %7, %49 : vector<12x128xi32>
    %51 = vector.extract_strided_slice %5 {offsets = [5, 0], sizes = [1, 128], strides = [1, 1]} : vector<16x128xf32> to vector<1x128xf32>
    %cst_13 = arith.constant 0xFF800000 : f32
    %52 = vector.shape_cast %51 : vector<1x128xf32> to vector<1x128xf32>
    %53 = vector.broadcast %52 : vector<1x128xf32> to vector<12x128xf32>
    %54 = vector.broadcast %cst_13 : f32 to vector<12x128xf32>
    %55 = arith.select %50, %53, %54 : vector<12x128xi1>, vector<12x128xf32>
    %56 = arith.maximumf %48, %55 : vector<12x128xf32>
    %c6_i32 = arith.constant 6 : i32
    %57 = vector.broadcast %c6_i32 : i32 to vector<12x128xi32>
    %58 = arith.cmpi eq, %7, %57 : vector<12x128xi32>
    %59 = vector.extract_strided_slice %5 {offsets = [6, 0], sizes = [1, 128], strides = [1, 1]} : vector<16x128xf32> to vector<1x128xf32>
    %cst_14 = arith.constant 0xFF800000 : f32
    %60 = vector.shape_cast %59 : vector<1x128xf32> to vector<1x128xf32>
    %61 = vector.broadcast %60 : vector<1x128xf32> to vector<12x128xf32>
    %62 = vector.broadcast %cst_14 : f32 to vector<12x128xf32>
    %63 = arith.select %58, %61, %62 : vector<12x128xi1>, vector<12x128xf32>
    %64 = arith.maximumf %56, %63 : vector<12x128xf32>
    %c7_i32 = arith.constant 7 : i32
    %65 = vector.broadcast %c7_i32 : i32 to vector<12x128xi32>
    %66 = arith.cmpi eq, %7, %65 : vector<12x128xi32>
    %67 = vector.extract_strided_slice %5 {offsets = [7, 0], sizes = [1, 128], strides = [1, 1]} : vector<16x128xf32> to vector<1x128xf32>
    %cst_15 = arith.constant 0xFF800000 : f32
    %68 = vector.shape_cast %67 : vector<1x128xf32> to vector<1x128xf32>
    %69 = vector.broadcast %68 : vector<1x128xf32> to vector<12x128xf32>
    %70 = vector.broadcast %cst_15 : f32 to vector<12x128xf32>
    %71 = arith.select %66, %69, %70 : vector<12x128xi1>, vector<12x128xf32>
    %72 = arith.maximumf %64, %71 : vector<12x128xf32>
    %c8_i32 = arith.constant 8 : i32
    %73 = vector.broadcast %c8_i32 : i32 to vector<12x128xi32>
    %74 = arith.cmpi eq, %7, %73 : vector<12x128xi32>
    %75 = vector.extract_strided_slice %5 {offsets = [8, 0], sizes = [1, 128], strides = [1, 1]} : vector<16x128xf32> to vector<1x128xf32>
    %cst_16 = arith.constant 0xFF800000 : f32
    %76 = vector.shape_cast %75 : vector<1x128xf32> to vector<1x128xf32>
    %77 = vector.broadcast %76 : vector<1x128xf32> to vector<12x128xf32>
    %78 = vector.broadcast %cst_16 : f32 to vector<12x128xf32>
    %79 = arith.select %74, %77, %78 : vector<12x128xi1>, vector<12x128xf32>
    %80 = arith.maximumf %72, %79 : vector<12x128xf32>
    %c9_i32 = arith.constant 9 : i32
    %81 = vector.broadcast %c9_i32 : i32 to vector<12x128xi32>
    %82 = arith.cmpi eq, %7, %81 : vector<12x128xi32>
    %83 = vector.extract_strided_slice %5 {offsets = [9, 0], sizes = [1, 128], strides = [1, 1]} : vector<16x128xf32> to vector<1x128xf32>
    %cst_17 = arith.constant 0xFF800000 : f32
    %84 = vector.shape_cast %83 : vector<1x128xf32> to vector<1x128xf32>
    %85 = vector.broadcast %84 : vector<1x128xf32> to vector<12x128xf32>
    %86 = vector.broadcast %cst_17 : f32 to vector<12x128xf32>
    %87 = arith.select %82, %85, %86 : vector<12x128xi1>, vector<12x128xf32>
    %88 = arith.maximumf %80, %87 : vector<12x128xf32>
    %c10_i32 = arith.constant 10 : i32
    %89 = vector.broadcast %c10_i32 : i32 to vector<12x128xi32>
    %90 = arith.cmpi eq, %7, %89 : vector<12x128xi32>
    %91 = vector.extract_strided_slice %5 {offsets = [10, 0], sizes = [1, 128], strides = [1, 1]} : vector<16x128xf32> to vector<1x128xf32>
    %cst_18 = arith.constant 0xFF800000 : f32
    %92 = vector.shape_cast %91 : vector<1x128xf32> to vector<1x128xf32>
    %93 = vector.broadcast %92 : vector<1x128xf32> to vector<12x128xf32>
    %94 = vector.broadcast %cst_18 : f32 to vector<12x128xf32>
    %95 = arith.select %90, %93, %94 : vector<12x128xi1>, vector<12x128xf32>
    %96 = arith.maximumf %88, %95 : vector<12x128xf32>
    %c11_i32 = arith.constant 11 : i32
    %97 = vector.broadcast %c11_i32 : i32 to vector<12x128xi32>
    %98 = arith.cmpi eq, %7, %97 : vector<12x128xi32>
    %99 = vector.extract_strided_slice %5 {offsets = [11, 0], sizes = [1, 128], strides = [1, 1]} : vector<16x128xf32> to vector<1x128xf32>
    %cst_19 = arith.constant 0xFF800000 : f32
    %100 = vector.shape_cast %99 : vector<1x128xf32> to vector<1x128xf32>
    %101 = vector.broadcast %100 : vector<1x128xf32> to vector<12x128xf32>
    %102 = vector.broadcast %cst_19 : f32 to vector<12x128xf32>
    %103 = arith.select %98, %101, %102 : vector<12x128xi1>, vector<12x128xf32>
    %104 = arith.maximumf %96, %103 : vector<12x128xf32>
    %c12_i32 = arith.constant 12 : i32
    %105 = vector.broadcast %c12_i32 : i32 to vector<12x128xi32>
    %106 = arith.cmpi eq, %7, %105 : vector<12x128xi32>
    %107 = vector.extract_strided_slice %5 {offsets = [12, 0], sizes = [1, 128], strides = [1, 1]} : vector<16x128xf32> to vector<1x128xf32>
    %cst_20 = arith.constant 0xFF800000 : f32
    %108 = vector.shape_cast %107 : vector<1x128xf32> to vector<1x128xf32>
    %109 = vector.broadcast %108 : vector<1x128xf32> to vector<12x128xf32>
    %110 = vector.broadcast %cst_20 : f32 to vector<12x128xf32>
    %111 = arith.select %106, %109, %110 : vector<12x128xi1>, vector<12x128xf32>
    %112 = arith.maximumf %104, %111 : vector<12x128xf32>
    %c13_i32 = arith.constant 13 : i32
    %113 = vector.broadcast %c13_i32 : i32 to vector<12x128xi32>
    %114 = arith.cmpi eq, %7, %113 : vector<12x128xi32>
    %115 = vector.extract_strided_slice %5 {offsets = [13, 0], sizes = [1, 128], strides = [1, 1]} : vector<16x128xf32> to vector<1x128xf32>
    %cst_21 = arith.constant 0xFF800000 : f32
    %116 = vector.shape_cast %115 : vector<1x128xf32> to vector<1x128xf32>
    %117 = vector.broadcast %116 : vector<1x128xf32> to vector<12x128xf32>
    %118 = vector.broadcast %cst_21 : f32 to vector<12x128xf32>
    %119 = arith.select %114, %117, %118 : vector<12x128xi1>, vector<12x128xf32>
    %120 = arith.maximumf %112, %119 : vector<12x128xf32>
    %c14_i32 = arith.constant 14 : i32
    %121 = vector.broadcast %c14_i32 : i32 to vector<12x128xi32>
    %122 = arith.cmpi eq, %7, %121 : vector<12x128xi32>
    %123 = vector.extract_strided_slice %5 {offsets = [14, 0], sizes = [1, 128], strides = [1, 1]} : vector<16x128xf32> to vector<1x128xf32>
    %cst_22 = arith.constant 0xFF800000 : f32
    %124 = vector.shape_cast %123 : vector<1x128xf32> to vector<1x128xf32>
    %125 = vector.broadcast %124 : vector<1x128xf32> to vector<12x128xf32>
    %126 = vector.broadcast %cst_22 : f32 to vector<12x128xf32>
    %127 = arith.select %122, %125, %126 : vector<12x128xi1>, vector<12x128xf32>
    %128 = arith.maximumf %120, %127 : vector<12x128xf32>
    %c15_i32_23 = arith.constant 15 : i32
    %129 = vector.broadcast %c15_i32_23 : i32 to vector<12x128xi32>
    %130 = arith.cmpi eq, %7, %129 : vector<12x128xi32>
    %131 = vector.extract_strided_slice %5 {offsets = [15, 0], sizes = [1, 128], strides = [1, 1]} : vector<16x128xf32> to vector<1x128xf32>
    %cst_24 = arith.constant 0xFF800000 : f32
    %132 = vector.shape_cast %131 : vector<1x128xf32> to vector<1x128xf32>
    %133 = vector.broadcast %132 : vector<1x128xf32> to vector<12x128xf32>
    %134 = vector.broadcast %cst_24 : f32 to vector<12x128xf32>
    %135 = arith.select %130, %133, %134 : vector<12x128xi1>, vector<12x128xf32>
    %136 = arith.maximumf %128, %135 : vector<12x128xf32>
    %c120_i32 = arith.constant 120 : i32
    %137 = tpu.dynamic_rotate %136 by %c120_i32 dim 1 : vector<12x128xf32>, i32 -> vector<12x128xf32>
    %138 = arith.maximumf %136, %137 : vector<12x128xf32>
    %c0_25 = arith.constant 0 : index
    %c0_26 = arith.constant 0 : index
    %c0_27 = arith.constant 0 : index
    %139 = vector.load %arg4[%c0_25, %c0_26, %c0_27] : memref<1x128x128xf32, #tpu.memory_space<vmem>>, vector<1x128x128xf32>
    %140 = vector.shape_cast %139 : vector<1x128x128xf32> to vector<128x128xf32>
    %cst_28 = arith.constant dense<0.000000e+00> : vector<12x128xf32>
    %141 = tpu.matmul %138, %140, %cst_28 {dimension_numbers = #tpu.dot_dimension_numbers<[1], [0], [0], [1], [0, 0, 1, 1], [], []>} : vector<12x128xf32>, vector<128x128xf32>, vector<12x128xf32> -> vector<12x128xf32>
    %c0_29 = arith.constant 0 : index
    %c0_30 = arith.constant 0 : index
    %c0_31 = arith.constant 0 : index
    %142 = vector.load %arg5[%c0_29, %c0_30, %c0_31] : memref<1x12x128xf32, #tpu.memory_space<vmem>>, vector<1x12x128xf32>
    %143 = vector.shape_cast %142 : vector<1x12x128xf32> to vector<12x128xf32>
    %144 = vector.shape_cast %141 : vector<12x128xf32> to vector<1x12x128xf32>
    tpu.vector_store %arg5[%c0_29, %c0_30, %c0_31], %144 {strides = array<i32>} : memref<1x12x128xf32, #tpu.memory_space<vmem>>, vector<1x12x128xf32>,
    return
  }
  func.func @transform_0(%arg0: i32) -> (i32, i32, i32) {
    %c0_i32 = arith.constant 0 : i32
    %c0_i32_0 = arith.constant 0 : i32
    %c0_i32_1 = arith.constant 0 : i32
    return %arg0, %c0_i32, %c0_i32_0 : i32, i32, i32
  }
  func.func @transform_1(%arg0: i32) -> (i32, i32) {
    %c0_i32 = arith.constant 0 : i32
    %c0_i32_0 = arith.constant 0 : i32
    %c0_i32_1 = arith.constant 0 : i32
    return %c0_i32, %c0_i32_0 : i32, i32
  }
  func.func @transform_2(%arg0: i32) -> (i32, i32, i32) {
    %c0_i32 = arith.constant 0 : i32
    %c0_i32_0 = arith.constant 0 : i32
    %c0_i32_1 = arith.constant 0 : i32
    return %arg0, %c0_i32, %c0_i32_0 : i32, i32, i32
  }
  func.func @transform_3(%arg0: i32) -> (i32, i32, i32) {
    %c0_i32 = arith.constant 0 : i32
    %c0_i32_0 = arith.constant 0 : i32
    %c0_i32_1 = arith.constant 0 : i32
    return %arg0, %c0_i32, %c0_i32_0 : i32, i32, i32
  }
  func.func @transform_4(%arg0: i32) -> (i32, i32, i32) {
    %c0_i32 = arith.constant 0 : i32
    %c0_i32_0 = arith.constant 0 : i32
    %c0_i32_1 = arith.constant 0 : i32
    return %arg0, %c0_i32, %c0_i32_0 : i32, i32, i32
  }
}

</mosaic_0001>

<bundles_post_ra>
// kernel: tpu_custom_call.1
= control target key start
LH: loop header
LB: loop body
LE: loop exit
PB: predicated region body
PF: predicated region fallthrough
CT: control target
= control target key end

     0   :  { %9 = vsyncpa [#allocation3], 0  ;;  %s1881_s0 = inlined_call_operand.hbm [shape: bf16[2,16,592], index: 0, kind: input, shape index: {}]   ;;  %s1882_s1 = inlined_call_operand.hbm [shape: bf16[592,128], index: 1, kind: input, shape index: {}]   ;;  %s1883_s2 = inlined_call_operand.vmem [shape: s32[2,12,128], index: 2, kind: input, shape index: {}]   ;;  %s1884_s3 = inlined_call_operand.hbm [shape: f32[2,128,128], index: 3, kind: input, shape index: {}]   ;;  %s1885_s4 = inlined_call_operand.vmem [shape: f32[2,12,128], index: 4, kind: output, shape index: {}]  }
   0x1   :  { %11 = vsyncpa [#allocation3 + $0x1], 0 }
   0x2   :  { %12 = vsyncpa [#allocation5], 0  ;;  %s1581_s15 = smov 0   ;;  %s1583_s16 = smov 0  }
   0x3   :  { %s1585_s17 = smov 0   ;;  %s1587_s18 = smov 0  }
   0x4 LB: > { %s1602_s19 = sadd.s32 1, %s1542_s18   ;;  %s25_s20 = sadd.s32 1, %s1538_s17  ;;  %s1542_s18 = sphi %s1587_s18, %s1898_s18   ;;  %s1538_s17 = sphi %s1585_s17, %s1897_s17   ;;  %s1534_s16 = sphi %s1583_s16, %s1896_s16   ;;  %s1530_s15 = sphi %s1581_s15, %s1895_s15  }
   0x5   : > { %s22_s21 = ssub.s32 %s1542_s18, %s1602_s19  ;;  %p32_p0 = scmp.ne.s32.totalorder %s1538_s17, %s1534_s16 }
   0x6   : > { %p23_p1 = scmp.eq.s32.totalorder %s22_s21, 0  ;;  %p33_p2 = scmp.eq.s32.totalorder %s1542_s18, 0 }
   0x7   : > { %p1325_p3 = scmp.lt.s32.totalorder %s1542_s18, 2  ;;  %s174_s23 = sand.u32 1, %s1542_s18  }
   0x8   : > { %s1612_s22 = scalar_select %p23_p1, %s1538_s17, %s25_s20  }
   0x9   : > { %p34_p4 = por %p33_p2, %p32_p0  ;;  %s176_s24 = sand.u32 1, %s1538_s17  }
   0xa   : > { %s1302_s25 = smul.u32 40, %s176_s24  ;;  %s1630_s7 = scalar_lea.sflag [#allocation3], %s174_s23 }
   0xb   : > { %p1618_p5 = pnand %p1325_p3, %p34_p4  ;;  %s1303_s27 = smul.u32 640, %s1542_s18 }
   0xc   : > { %s178_s5 = scalar_lea.vmem [#allocation2], %s1302_s25  ;;  %s1423_s11 = scalar_lea.hbm %s1881_s0, 1280 }
   0xd   : > { %s1626_s30 = scalar_lea.hbm %s1881_s0, %s1303_s27  ;;  %s185_s6 = sshll.u32 %s178_s5, 4  ;;  %s1628_s6 = int_to_ptr.vmem [resolvable:$true] %s185_s6 }
   0xe   : > { %s1418_s8 = scalar_lea.hbm %s1626_s30, 640  ;;  %p1420_p7 = pneg %p1618_p5 }
   0xf   : > { %p1419_p6 = scmp.ne.s32.totalorder %s1626_s30, %s1418_s8  ;;  %p1424_p10 = scmp.lt.s32.totalorder %s1626_s30, %s1881_s0 }
  0x10   : > { %p1425_p11 = scmp.lt.s32.totalorder %s1423_s11, %s1418_s8 }
  0x11   : > { %p1421_p8 = pnand %p1420_p7, %p1419_p6 }
  0x12   : > { %p1426_p12 = por %p1425_p11, %p1424_p10 }
  0x13   : > { %p1422_p9 = pneg %p1421_p8 }
  0x15   : > { %p1427_p13 = pnand %p1426_p12, %p1422_p9 }
  0x17   : > { %1430 = shalt.err (!%p1427_p13)
}
  0x18   : > { %s1431_s14 = scalar_lea.vmem %s1628_s6, 640  ;;  %s1544_s20 = smov [#allocation2]  }
  0x19   : > { %p1432_p0 = scmp.ne.s32.totalorder %s1628_s6, %s1431_s14  ;;  %s1436_s21 = sshll.u32 %s1544_s20, 4  ;;  %s1437_s21 = int_to_ptr.vmem [resolvable:$false] %s1436_s21 }
  0x1a   : > { %s1438_s23 = scalar_lea.vmem %s1437_s21, 1280  ;;  %p1439_p3 = scmp.lt.s32.totalorder %s1628_s6, %s1437_s21 }
  0x1b   : > { %p1434_p1 = pnand %p1432_p0, %p1420_p7  ;;  %p1440_p4 = scmp.lt.s32.totalorder %s1438_s23, %s1431_s14 }
  0x1d   : > { %p1435_p2 = pneg %p1434_p1  ;;  %p1441_p6 = por %p1440_p4, %p1439_p3 }
  0x1f   : > { %p1442_p8 = pnand %p1441_p6, %p1435_p2 }
  0x21   : > { %1445 = shalt.err (!%p1442_p8)
}
  0x22   : > { %s1545_s25 = smov 320   ;;  %s1546_s27 = smov 20  }
  0x23   : > { %1320 = dma.hbm_to_vmem [thread:$0]  (!%p1618_p5), %s1626_s30, 640, %s1628_s6, %s1630_s7, %s1545_s25, %s1545_s25, %s1546_s27  }
  0x24   : > { %s1127_s28 = sshll.u32 %s176_s24, 7  ;;  %s1660_s29 = sadd.s32 4294967295, %s1542_s18  }
  0x25   : > { %p38_p9 = scmp.ne.s32.totalorder %s1534_s16, %s1530_s15  ;;  %p1886_p10 = scmp.eq.s32.totalorder %s1660_s29, 0 }
  0x26   : > { %p1123_p11 = scmp.ge.s32.totalorder %s1542_s18, 1  ;;  %p148_p12 = scmp.lt.s32.totalorder %s1542_s18, 3 }
  0x27   : > { %p1669_p13 = por %p1886_p10, %p38_p9  ;;  %s1547_s24 = smov [#allocation4]  }
  0x28   : > { %p1673_p0 = pnand %p1123_p11, %p148_p12  ;;  %s160_s30 = sshll.u32 %s1547_s24, 4  ;;  %s161_s30 = int_to_ptr.vmem [resolvable:$true] %s160_s30 }
  0x29   : > { %s1889_s5 = scalar_select %p1669_p13, 1, 0 }
  0x2a   : > { %p1313_p1 = pneg %p1673_p0  ;;  %s1182_s6 = sshll.u32 %s1542_s18, 11 }
  0x2b   : > { %s207_s15 = scalar_lea.vmem [#allocation6], %s1127_s28  ;;  %s1689_s13 = scalar_lea.hbm %s1884_s3, %s1182_s6 }
  0x2c   : > { %s214_s9 = sshll.u32 %s207_s15, 4  ;;  %p1682_p2 = pnand %p1313_p1, %p1886_p10  ;;  %s1691_s9 = int_to_ptr.vmem [resolvable:$true] %s214_s9 }
  0x2d   : > { %s1457_s14 = scalar_lea.vmem %s161_s30, 4736  ;;  %p1465_p9 = scmp.lt.s32.totalorder %s161_s30, %s161_s30 }
  0x2e   : > { %p1448_p3 = pneg %p1682_p2  ;;  %p1458_p4 = scmp.ne.s32.totalorder %s161_s30, %s1457_s14 }
  0x2f   : > { %p1466_p11 = scmp.lt.s32.totalorder %s1457_s14, %s1457_s14 }
  0x30   : > { %p1460_p6 = pnand %p1458_p4, %p1448_p3 }
  0x31   : > { %p1467_p12 = por %p1466_p11, %p1465_p9 }
  0x32   : > { %p1461_p8 = pneg %p1460_p6 }
  0x34   : > { %p1468_p1 = pnand %p1467_p12, %p1461_p8 }
  0x36   : > { %1471 = shalt.err (!%p1468_p1)
}
  0x37   : > { %s1548_s18 = smov 64   ;;  %s1549_s20 = smov 4  }
  0x38   : > { %1316 = dma.hbm_to_vmem [thread:$0]  (!%p1682_p2), %s1882_s1, 4736, %s161_s30, [#allocation5], %s1548_s18, %s1548_s18, %s1549_s20  }
  0x39   : > { %s1472_s25 = scalar_lea.hbm %s1689_s13, 2048  ;;  %s1477_s24 = scalar_lea.hbm %s1884_s3, 4096 }
  0x3a   : > { %p1473_p3 = scmp.ne.s32.totalorder %s1689_s13, %s1472_s25  ;;  %p1478_p8 = scmp.lt.s32.totalorder %s1689_s13, %s1884_s3 }
  0x3b   : > { %p1479_p9 = scmp.lt.s32.totalorder %s1477_s24, %s1472_s25 }
  0x3c   : > { %p1475_p4 = pnand %p1473_p3, %p1420_p7 }
  0x3d   : > { %p1480_p11 = por %p1479_p9, %p1478_p8 }
  0x3e   : > { %p1476_p6 = pneg %p1475_p4 }
  0x40   : > { %p1481_p12 = pnand %p1480_p11, %p1476_p6 }
  0x42   : > { %1484 = shalt.err (!%p1481_p12)
}
  0x43   : > { %s1485_s30 = scalar_lea.vmem %s1691_s9, 2048  ;;  %s1550_s10 = smov [#allocation6]  }
  0x44   : > { %p1486_p2 = scmp.ne.s32.totalorder %s1691_s9, %s1485_s30  ;;  %s1490_s11 = sshll.u32 %s1550_s10, 4  ;;  %s1491_s11 = int_to_ptr.vmem [resolvable:$false] %s1490_s11 }
  0x45   : > { %s1492_s12 = scalar_lea.vmem %s1491_s11, 4096  ;;  %p1493_p4 = scmp.lt.s32.totalorder %s1691_s9, %s1491_s11 }
  0x46   : > { %p1488_p1 = pnand %p1486_p2, %p1420_p7  ;;  %p1494_p10 = scmp.lt.s32.totalorder %s1492_s12, %s1485_s30 }
  0x48   : > { %p1489_p3 = pneg %p1488_p1  ;;  %p1495_p13 = por %p1494_p10, %p1493_p4 }
  0x4a   : > { %p1496_p8 = pnand %p1495_p13, %p1489_p3 }
  0x4c   : > { %1499 = shalt.err (!%p1496_p8)
}
  0x4d   : > { %s1551_s14 = smov 128   ;;  %s1552_s18 = smov 8  }
  0x4e   : > { %1323 = dma.hbm_to_vmem [thread:$0]  (!%p1618_p5), %s1689_s13, 2048, %s1691_s9, %s1630_s7, %s1551_s14, %s1551_s14, %s1552_s18  }
  0x4f   : > { %226 = sbr.rel (%p1673_p0) target bundleno = 700 (0x2bc), region = 36  ;;  %s228_s20 = sand.u32 (!%p1673_p0), 1, %s1660_s29  }
  0x50   : > { %s230_s21 = sand.u32 (!%p1673_p0), 1, %s1534_s16   ;;  %s229_s25 = scalar_lea.sflag (!%p1673_p0), [#allocation3], %s228_s20 }
  0x51   : > { %s1304_s23 = smul.u32 (!%p1673_p0), 40, %s230_s21  ;;  %p1892_p7 = scmp.ne.s32.totalorder (!%p1673_p0), %s1889_s5, 0 }
  0x53   : > { %s1727_s27 = scalar_lea.vmem (!%p1673_p0), [#allocation2], %s1304_s23 }
  0x54   : > { %1517 = dma.done.wait (%p1892_p7), %s229_s25, 640  }
  0x55   : > { %1519 = vsyncadd (%p1892_p7), %s229_s25, 4294966656  ;;  %p1893_p10 = scmp.eq.s32.totalorder %s1660_s29, 0 }
  0x57   : > { %1521 = dma.done.wait (%p1893_p10), [#allocation5], 4736   ;;  %p1894_p5 = pmov %p1893_p10 }
  0x58   : > { %s1132_s26 = sshll.u32 %s230_s21, 7 }
  0x59   : > { %1523 = vsyncadd (%p1894_p5), [#allocation5], 4294962560  ;;  %s1737_s7 = scalar_lea.vmem [#allocation6], %s1132_s26 }
  0x5a   : > { %1525 = dma.done.wait (%p1892_p7), %s229_s25, 2048  }
  0x5b   : > { %1527 = vsyncadd (%p1892_p7), %s229_s25, 4294965248  ;;  %v1374_v0 = vld [vmem:[#allocation4 + $0x78] sm:$0xff]   ;;  %v1378_v4 = vld [vmem:[#allocation4 + $0x70] sm:$0xff]   ;;  %v1553_v34 = vmov 0.0   ;;  %vm1554_vm0 = vmmov 0   ;;  %vm618_vm1 = vcmask 654336  }
  0x5c   : > { %v1375_v1 = vld [vmem:[#allocation4 + $0xf8] sm:$0xff]   ;;  %1185 = vmatprep.subr.bf16.mxu0 %v1374_v0  ;;  %v1379_v5 = vld [vmem:[#allocation4 + $0xf0] sm:$0xff]   ;;  %v1382_v8 = vld [vmem:[#allocation4 + $0x68] sm:$0xff]   ;;  %p280_p13 = scmp.lt.s32.totalorder %s1660_s29, 1  ;;  %s1555_s28 = smov 120  }
  0x5d   : > { %v1376_v2 = vld [vmem:[#allocation4 + $0x38] sm:$0xff]   ;;  %1207 = vmatprep.subr.bf16.mxu1 %v1375_v1  ;;  %v1380_v6 = vld [vmem:[#allocation4 + $0x30] sm:$0xff]   ;;  %v1383_v9 = vld [vmem:[#allocation4 + $0xe8] sm:$0xff]  }
  0x5e   : > { %v1377_v3 = vld [vmem:[#allocation4 + $0xb8] sm:$0xff]   ;;  %1186 = vmatpush3.bf16.msra.mxu0 %v1376_v2  ;;  %v1381_v7 = vld [vmem:[#allocation4 + $0xb0] sm:$0xff]   ;;  %v1384_v10 = vld [vmem:[#allocation4 + $0x28] sm:$0xff]   ;;  %s1900_s29 = smov (!%p280_p13, %s1660_s29), 1 }
  0x5f   : > { %1208 = vmatpush3.bf16.msra.mxu1 %v1377_v3  ;;  %1187 = vmatprep.subr.bf16.mxu0 %v1378_v4  ;;  %v1385_v11 = vld [vmem:[#allocation4 + $0xa8] sm:$0xff]   ;;  %v1386_v12 = vld [vmem:[#allocation4 + $0x60] sm:$0xff]   ;;  %v1390_v16 = vld [vmem:[#allocation4 + $0x58] sm:$0xff]   ;;  %v747_v3 = vlaneseq  ;;  %s1183_s5 = sshll.u32 %s1900_s29, 4 }
  0x60   : > { %1209 = vmatprep.subr.bf16.mxu1 %v1379_v5  ;;  %v1387_v13 = vld [vmem:[#allocation4 + $0xe0] sm:$0xff]   ;;  %v1391_v17 = vld [vmem:[#allocation4 + $0xd8] sm:$0xff]   ;;  %v1394_v20 = vld [vmem:[#allocation4 + $0x50] sm:$0xff]   ;;  %s284_s13 = scalar_lea.vmem %s1883_s2, %s1183_s5  ;;  %s289_s15 = scalar_lea.vmem %s1885_s4, %s1183_s5 }
  0x61   : > { %v1388_v14 = vld [vmem:[#allocation4 + $0x20] sm:$0xff]   ;;  %v1392_v18 = vld [vmem:[#allocation4 + $0x18] sm:$0xff]   ;;  %v1395_v21 = vld [vmem:[#allocation4 + $0xd0] sm:$0xff]  }
  0x62   : > { %1188 = vmatpush3.bf16.msra.mxu0 %v1380_v6  ;;  %v1389_v15 = vld [vmem:[#allocation4 + $0xa0] sm:$0xff]   ;;  %v1393_v19 = vld [vmem:[#allocation4 + $0x98] sm:$0xff]   ;;  %v1396_v22 = vld [vmem:[#allocation4 + $0x10] sm:$0xff]  }
  0x63   : > { %1210 = vmatpush3.bf16.msra.mxu1 %v1381_v7  ;;  %1189 = vmatprep.subr.bf16.mxu0 %v1382_v8  ;;  %v1397_v23 = vld [vmem:[#allocation4 + $0x90] sm:$0xff]   ;;  %v1398_v24 = vld [vmem:[#allocation4 + $0x48] sm:$0xff]   ;;  %v1402_v28 = vld [vmem:[#allocation4 + $0x40] sm:$0xff]  }
  0x64   : > { %1211 = vmatprep.subr.bf16.mxu1 %v1383_v9  ;;  %v1399_v25 = vld [vmem:[#allocation4 + $0xc8] sm:$0xff]   ;;  %v1403_v29 = vld [vmem:[#allocation4 + $0xc0] sm:$0xff]   ;;  %v1413_v38 = vld [vmem:[#allocation4 + $0x118] sm:$0xff]   ;;  %v1766_v9 = vshrl.u32 %v747_v3, 7 }
  0x65   : > { %v1400_v26 = vld [vmem:[#allocation4 + $0x8] sm:$0xff]   ;;  %v1404_v30 = vld [vmem:[#allocation4] sm:$0xff]   ;;  %v1414_v39 = vld [vmem:[#allocation4 + $0x110] sm:$0xff]  }
  0x66   : > { %1190 = vmatpush3.bf16.msra.mxu0 %v1384_v10  ;;  %v1401_v27 = vld [vmem:[#allocation4 + $0x88] sm:$0xff]   ;;  %v1405_v31 = vld [vmem:[#allocation4 + $0x80] sm:$0xff]   ;;  %v934_v44 = vld [vmem:[%s1737_s7 + $0x70] sm:$0xff]  ;;  %vm749_vm2 = vcmp.lt.s32.totalorder %v1766_v9, 7 }
  0x67   : > { %1212 = vmatpush3.bf16.msra.mxu1 %v1385_v11  ;;  %1191 = vmatprep.subr.bf16.mxu0 %v1386_v12  ;;  %v1406_v32 = vld [vmem:[%s1727_s27] ss:$20 sps:$4 sm:$0xff]   ;;  %v1408_v33 = vld [vmem:[%s1727_s27 + $0x4] ss:$20 sps:$4 sm:$0xff]   ;;  %v1409_v35 = vld [vmem:[%s1727_s27 + $0x8] ss:$20 sps:$4 sm:$0xff]  }
  0x68   : > { %1213 = vmatprep.subr.bf16.mxu1 %v1387_v13  ;;  %v1411_v36 = vld [vmem:[%s1727_s27 + $0xc] ss:$20 sps:$4 sm:$0xff]   ;;  %654 = vmatprep.mubr.bf16.mxu0 %v1408_v33  ;;  %v1415_v40 = vld [vmem:[#allocation4 + $0x108] sm:$0xff]  }
  0x69   : > { %v1412_v37 = vld [vmem:[#allocation4 + $0x120] sm:$0xff]   ;;  %695 = vmatprep.mubr.bf16.mxu1 %v1411_v36  ;;  %v933_v45 = vld [vmem:[%s1737_s7 + $0x68] sm:$0xff]  ;;  %v932_v46 = vld [vmem:[%s1737_s7 + $0x60] sm:$0xff] }
  0x6a   : > { %1192 = vmatpush3.bf16.msra.mxu0 %v1388_v14  ;;  %v1416_v41 = vld [vmem:[#allocation4 + $0x100] sm:$0xff]   ;;  %v930_v48 = vld [vmem:[%s1737_s7 + $0x50] sm:$0xff]  ;;  %v929_v49 = vld [vmem:[%s1737_s7 + $0x48] sm:$0xff] }
  0x6b   : > { %1214 = vmatpush3.bf16.msra.mxu1 %v1389_v15  ;;  %1193 = vmatprep.subr.bf16.mxu0 %v1390_v16  ;;  %v1417_v42 = vld [vmem:[%s1727_s27 + $0x10] ss:$20 sps:$4 sm:$0xff]  }
  0x6c   : > { %1215 = vmatprep.subr.bf16.mxu1 %v1391_v17  ;;  %v935_v43 = vld [vmem:[%s1737_s7 + $0x78] sm:$0xff]  ;;  %v928_v50 = vld [vmem:[%s1737_s7 + $0x40] sm:$0xff]  ;;  %v926_v52 = vld [vmem:[%s1737_s7 + $0x30] sm:$0xff] }
  0x6d   : > { %v931_v47 = vld [vmem:[%s1737_s7 + $0x58] sm:$0xff]  ;;  %v925_v53 = vld [vmem:[%s1737_s7 + $0x28] sm:$0xff]  ;;  %v924_v54 = vld [vmem:[%s1737_s7 + $0x20] sm:$0xff] }
  0x6e   : > { %1194 = vmatpush3.bf16.msra.mxu0 %v1392_v18  ;;  %v927_v51 = vld [vmem:[%s1737_s7 + $0x38] sm:$0xff]  ;;  %v922_v56 = vld [vmem:[%s1737_s7 + $0x10] sm:$0xff]  ;;  %v1775_v17 = vld [vmem:[%s284_s13] sm:$0xff] }
  0x6f   : > { %1216 = vmatpush3.bf16.msra.mxu1 %v1393_v19  ;;  %1195 = vmatprep.subr.bf16.mxu0 %v1394_v20  ;;  %v923_v55 = vld [vmem:[%s1737_s7 + $0x18] sm:$0xff]  ;;  %v1777_v18 = vld [vmem:[%s284_s13 + $0x8] sm:$0xf]  ;;  %v760_v19 = vsub.s32 0, %v1766_v9  ;;  %v768_v20 = vsub.s32 1, %v1766_v9  ;;  %vm756_vm3 = vcmp.eq.s32.totalorder %v1775_v17, 0 }
  0x70   : > { %1217 = vmatprep.subr.bf16.mxu1 %v1395_v21  ;;  %v778_v21 = vsub.s32 2, %v1766_v9  ;;  %vm757_vm4 = vcmp.eq.s32.totalorder %v1777_v18, 0  ;;  %vm764_vm5 = vcmp.eq.s32.totalorder %v1775_v17, 1  ;;  %vm765_vm6 = vcmp.eq.s32.totalorder %v1777_v18, 1 }
  0x71   : > { %vm774_vm7 = vcmp.eq.s32.totalorder %v1775_v17, 2  ;;  %vm775_vm8 = vcmp.eq.s32.totalorder %v1777_v18, 2  ;;  %vm784_vm9 = vcmp.eq.s32.totalorder %v1775_v17, 3  ;;  %vm785_vm10 = vcmp.eq.s32.totalorder %v1777_v18, 3 }
  0x72   : > { %1196 = vmatpush3.bf16.msra.mxu0 %v1396_v22  ;;  %vm794_vm11 = vcmp.eq.s32.totalorder %v1775_v17, 4  ;;  %vm795_vm12 = vcmp.eq.s32.totalorder %v1777_v18, 4  ;;  %vm804_vm13 = vcmp.eq.s32.totalorder %v1775_v17, 5  ;;  %vm805_vm14 = vcmp.eq.s32.totalorder %v1777_v18, 5 }
  0x73   : > { %1218 = vmatpush3.bf16.msra.mxu1 %v1397_v23  ;;  %1197 = vmatprep.subr.bf16.mxu0 %v1398_v24  ;;  %v788_v23 = vsub.s32 3, %v1766_v9  ;;  %vm814_vm15 = vcmp.eq.s32.totalorder %v1775_v17, 6 }
  0x74   : > { %1219 = vmatprep.subr.bf16.mxu1 %v1399_v25  ;;  %v798_v25 = vsub.s32 4, %v1766_v9 }
  0x76   : > { %1198 = vmatpush3.bf16.msra.mxu0 %v1400_v26 }
  0x77   : > { %1220 = vmatpush3.bf16.msra.mxu1 %v1401_v27  ;;  %1199 = vmatprep.subr.bf16.mxu0 %v1402_v28 }
  0x78   : > { %1221 = vmatprep.subr.bf16.mxu1 %v1403_v29  ;;  %v808_v29 = vsub.s32 5, %v1766_v9 }
  0x7a   : > { %1200 = vmatpush3.bf16.msra.mxu0 %v1404_v30 }
  0x7b   : > { %1222 = vmatpush3.bf16.msra.mxu1 %v1405_v31  ;;  %1253 = vmatprep.subr.bf16.mxu0 %v1553_v34  ;;  %v818_v31 = vsub.s32 6, %v1766_v9 }
  0x7c   : > { %1267 = vmatprep.subr.mxu1 %v935_v43 }
  0x7d   : > { %655 = vmatmul.mubr.bf16.vlgmr.msra.gmra.mxu0 %v1406_v32 }
  0x7e   : > { %696 = vmatmul.mubr.bf16.vlgmr.msra.gmra.mxu1 %v1409_v35  ;;  %1254 = vmatpush3.bf16.msra.mxu0 %v1412_v37 }
  0x7f   : > { %1255 = vmatprep.subr.bf16.mxu0 %v1553_v34  ;;  %1263 = vmatprep.mubr.msk.bf16.mxu0 %vm1554_vm0, %v1553_v34  ;;  %vm815_vm0 = vcmp.eq.s32.totalorder %v1777_v18, 6 }
  0x80   : > { %1268 = vmatpush3.msra.mxu1 %v935_v43 }
  0x81   : > { %1269 = vmatprep.subr.mxu1 %v934_v44 }
  0x82   : > { %1256 = vmatpush3.bf16.msra.mxu0 %v1413_v38  ;;  %1270 = vmatpush3.msra.mxu1 %v934_v44 }
  0x83   : > { %1257 = vmatprep.subr.bf16.mxu0 %v1553_v34  ;;  %1271 = vmatprep.subr.mxu1 %v933_v45 }
  0x84   : > { %1272 = vmatpush3.msra.mxu1 %v933_v45 }
  0x85   : > { %1273 = vmatprep.subr.mxu1 %v932_v46 }
  0x86   : > { %1258 = vmatpush3.bf16.msra.mxu0 %v1414_v39  ;;  %1274 = vmatpush3.msra.mxu1 %v932_v46 }
  0x87   : > { %1259 = vmatprep.subr.bf16.mxu0 %v1553_v34  ;;  %1275 = vmatprep.subr.mxu1 %v931_v47 }
  0x88   : > { %1276 = vmatpush3.msra.mxu1 %v931_v47  ;;  %v828_v47 = vsub.s32 7, %v1766_v9 }
  0x89   : > { %1277 = vmatprep.subr.mxu1 %v930_v48 }
  0x8a   : > { %1260 = vmatpush3.bf16.msra.mxu0 %v1415_v40  ;;  %1278 = vmatpush3.msra.mxu1 %v930_v48 }
  0x8b   : > { %1261 = vmatprep.subr.bf16.mxu0 %v1553_v34  ;;  %1279 = vmatprep.subr.mxu1 %v929_v49 }
  0x8c   : > { %1280 = vmatpush3.msra.mxu1 %v929_v49 }
  0x8d   : > { %1281 = vmatprep.subr.mxu1 %v928_v50 }
  0x8e   : > { %1262 = vmatpush3.bf16.msra.mxu0 %v1416_v41  ;;  %1282 = vmatpush3.msra.mxu1 %v928_v50 }
  0x8f   : > { %1283 = vmatprep.subr.mxu1 %v927_v51 }
  0x90   : > { %1284 = vmatpush3.msra.mxu1 %v927_v51 }
  0x91   : > { %1264 = vmatmul.mubr.msk.bf16.vlgmr.msra.gmra.mxu0 %vm618_vm1, %v1417_v42  ;;  %1285 = vmatprep.subr.mxu1 %v926_v52  ;;  %vm824_vm1 = vcmp.eq.s32.totalorder %v1775_v17, 7 }
  0x92   : > { %1286 = vmatpush3.msra.mxu1 %v926_v52 }
  0x93   : > { %1287 = vmatprep.subr.mxu1 %v925_v53 }
  0x94   : > { %1288 = vmatpush3.msra.mxu1 %v925_v53 }
  0x95   : > { %1289 = vmatprep.subr.mxu1 %v924_v54 }
  0x96   : > { %1290 = vmatpush3.msra.mxu1 %v924_v54 }
  0x97   : > { %1291 = vmatprep.subr.mxu1 %v923_v55 }
  0x98   : > { %1292 = vmatpush3.msra.mxu1 %v923_v55 }
  0x99   : > { %1293 = vmatprep.subr.mxu1 %v922_v56 }
  0x9a   : > { %1294 = vmatpush3.msra.mxu1 %v922_v56 }
 0x13d   : > { %v1201_v57 = vpop.f32.mrf.mxu0 }
 0x13e   : > { %v1223_v58 = vpop.f32.mrf.mxu1 }
 0x13f   : > { %v1202_v59 = vpop.f32.mrf.mxu0 }
 0x140   : > { %v1224_v60 = vpop.f32.mrf.mxu1  ;;  %v1203_v1 = vadd.f32 %v1202_v59, %v1201_v57 }
 0x141   : > { %v1204_v61 = vpop.f32.mrf.mxu0  ;;  %v1225_v2 = vadd.f32 %v1224_v60, %v1223_v58 }
 0x142   : > { %v1226_v62 = vpop.f32.mrf.mxu1 }
 0x143   : > { %v1205_v63 = vpop.f32.mrf.mxu0  ;;  %v698_v7 = vadd.f32 %v1225_v2, %v1203_v1 }
 0x144   : > { %v1227_v0 = vpop.f32.mrf.mxu1  ;;  %v1206_v4 = vadd.f32 %v1205_v63, %v1204_v61 }
 0x145   : > { %v1228_v5 = vadd.f32 %v1227_v0, %v1226_v62 }
 0x147   : > { %v701_v11 = vadd.f32 %v1228_v5, %v1206_v4 }
 0x151   : > { %v738_v6 = vpop.f32.mrf.mxu0 }
 0x152   : > { %v739_v10 = vadd.f32 %v738_v6, %v698_v7 }
 0x153   : > { %v1265_v8 = vpop.f32.mrf.mxu0 }
 0x154   : > { %v745_v15 = vrot.slane %v739_v10, 1 }
 0x155   : > { %v741_v12 = vpop.f32.mrf.mxu0 }
 0x156   : > { %v742_v13 = vadd.f32 %v741_v12, %v701_v11 }
 0x157   : > { %v1266_v14 = vpop.f32.mrf.mxu0 }
 0x158   : > { %v746_v16 = vrot.slane %v742_v13, 1 }
 0x15a   : > { %v750_v22 = vsel %vm749_vm2, %v745_v15, %v746_v16  ;;  %v751_v41 = vsel %vm749_vm2, %v746_v16, %v745_v15  ;;  %vm825_vm2 = vcmp.eq.s32.totalorder %v1777_v18, 7 }
 0x15b   : > { %v752_v24 = vmax.f32 %v739_v10, %v750_v22  ;;  %v1813_v50 = vmax.f32 %v742_v13, %v751_v41 }
 0x15d   : > { %v761_v26 = vrot.slane %v752_v24, %v760_v19  ;;  %v769_v27 = vrot.slane %v752_v24, %v768_v20  ;;  %v779_v28 = vrot.slane %v752_v24, %v778_v21  ;;  %v789_v30 = vrot.slane %v752_v24, %v788_v23 }
 0x15e   : > { %v799_v40 = vrot.slane %v752_v24, %v798_v25  ;;  %v809_v46 = vrot.slane %v752_v24, %v808_v29  ;;  %v819_v53 = vrot.slane %v752_v24, %v818_v31  ;;  %v829_v58 = vrot.slane %v752_v24, %v828_v47 }
 0x15f   : > { %v762_v32 = vsel %vm756_vm3, %v761_v26, -inf  ;;  %v763_v33 = vsel %vm757_vm4, %v761_v26, -inf  ;;  %v770_v34 = vsel %vm764_vm5, %v769_v27, -inf  ;;  %v771_v35 = vsel %vm765_vm6, %v769_v27, -inf }
 0x160   : > { %v772_v36 = vmax.f32 %v762_v32, %v770_v34  ;;  %v773_v37 = vmax.f32 %v763_v33, %v771_v35  ;;  %v780_v38 = vsel %vm774_vm7, %v779_v28, -inf  ;;  %v781_v39 = vsel %vm775_vm8, %v779_v28, -inf  ;;  %v921_v35 = vld [vmem:[%s1737_s7 + $0x8] sm:$0xff] }
 0x161   : > { %v790_v44 = vsel %vm784_vm9, %v789_v30, -inf  ;;  %v791_v45 = vsel %vm785_vm10, %v789_v30, -inf  ;;  %v800_v51 = vsel %vm794_vm11, %v799_v40, -inf  ;;  %v801_v52 = vsel %vm795_vm12, %v799_v40, -inf  ;;  %1295 = vmatprep.subr.mxu1 %v921_v35 }
 0x162   : > { %v782_v42 = vmax.f32 %v772_v36, %v780_v38  ;;  %v783_v43 = vmax.f32 %v773_v37, %v781_v39  ;;  %v810_v56 = vsel %vm804_vm13, %v809_v46, -inf  ;;  %v811_v57 = vsel %vm805_vm14, %v809_v46, -inf  ;;  %v920_v36 = vld [vmem:[%s1737_s7] sm:$0xff]  ;;  %1296 = vmatpush3.msra.mxu1 %v921_v35 }
 0x163   : > { %v820_v61 = vsel %vm814_vm15, %v819_v53, -inf  ;;  %v821_v62 = vsel %vm815_vm0, %v819_v53, -inf  ;;  %v839_v63 = vrot.slane %v1813_v50, %v760_v19  ;;  %vm834_vm3 = vcmp.eq.s32.totalorder %v1775_v17, 8  ;;  %1297 = vmatprep.subr.mxu1 %v920_v36 }
 0x164   : > { %v792_v48 = vmax.f32 %v782_v42, %v790_v44  ;;  %v793_v49 = vmax.f32 %v783_v43, %v791_v45  ;;  %vm835_vm4 = vcmp.eq.s32.totalorder %v1777_v18, 8  ;;  %v830_v2 = vsel %vm824_vm1, %v829_v58, -inf  ;;  %1298 = vmatpush3.msra.mxu1 %v920_v36 }
 0x165   : > { %v831_v3 = vsel %vm825_vm2, %v829_v58, -inf  ;;  %v849_v4 = vrot.slane %v1813_v50, %v768_v20  ;;  %vm844_vm5 = vcmp.eq.s32.totalorder %v1775_v17, 9  ;;  %vm845_vm6 = vcmp.eq.s32.totalorder %v1777_v18, 9 }
 0x166   : > { %v802_v54 = vmax.f32 %v792_v48, %v800_v51  ;;  %v803_v55 = vmax.f32 %v793_v49, %v801_v52  ;;  %v840_v7 = vsel %vm834_vm3, %v839_v63, -inf  ;;  %v841_v8 = vsel %vm835_vm4, %v839_v63, -inf }
 0x167   : > { %v859_v10 = vrot.slane %v1813_v50, %v778_v21  ;;  %vm854_vm7 = vcmp.eq.s32.totalorder %v1775_v17, 10  ;;  %vm855_vm8 = vcmp.eq.s32.totalorder %v1777_v18, 10  ;;  %v850_v13 = vsel %vm844_vm5, %v849_v4, -inf }
 0x168   : > { %v812_v59 = vmax.f32 %v802_v54, %v810_v56  ;;  %v813_v60 = vmax.f32 %v803_v55, %v811_v57  ;;  %v851_v14 = vsel %vm845_vm6, %v849_v4, -inf  ;;  %v869_v15 = vrot.slane %v1813_v50, %v788_v23 }
 0x169   : > { %vm864_vm9 = vcmp.eq.s32.totalorder %v1775_v17, 11  ;;  %vm865_vm10 = vcmp.eq.s32.totalorder %v1777_v18, 11  ;;  %v860_v20 = vsel %vm854_vm7, %v859_v10, -inf  ;;  %v861_v21 = vsel %vm855_vm8, %v859_v10, -inf }
 0x16a   : > { %v822_v0 = vmax.f32 %v812_v59, %v820_v61  ;;  %v823_v1 = vmax.f32 %v813_v60, %v821_v62  ;;  %v879_v22 = vrot.slane %v1813_v50, %v798_v25  ;;  %vm874_vm11 = vcmp.eq.s32.totalorder %v1775_v17, 12 }
 0x16b   : > { %vm875_vm12 = vcmp.eq.s32.totalorder %v1777_v18, 12  ;;  %v870_v23 = vsel %vm864_vm9, %v869_v15, -inf  ;;  %v871_v27 = vsel %vm865_vm10, %v869_v15, -inf  ;;  %v889_v28 = vrot.slane %v1813_v50, %v808_v29 }
 0x16c   : > { %v832_v5 = vmax.f32 %v822_v0, %v830_v2  ;;  %v833_v6 = vmax.f32 %v823_v1, %v831_v3  ;;  %vm884_vm13 = vcmp.eq.s32.totalorder %v1775_v17, 13  ;;  %vm885_vm14 = vcmp.eq.s32.totalorder %v1777_v18, 13 }
 0x16d   : > { %v880_v25 = vsel %vm874_vm11, %v879_v22, -inf  ;;  %v881_v33 = vsel %vm875_vm12, %v879_v22, -inf  ;;  %v899_v34 = vrot.slane %v1813_v50, %v818_v31  ;;  %vm894_vm15 = vcmp.eq.s32.totalorder %v1775_v17, 14 }
 0x16e   : > { %v842_v11 = vmax.f32 %v832_v5, %v840_v7  ;;  %v843_v12 = vmax.f32 %v833_v6, %v841_v8  ;;  %vm895_vm0 = vcmp.eq.s32.totalorder %v1777_v18, 14  ;;  %v890_v29 = vsel %vm884_vm13, %v889_v28, -inf }
 0x16f   : > { %v891_v39 = vsel %vm885_vm14, %v889_v28, -inf  ;;  %v909_v40 = vrot.slane %v1813_v50, %v828_v47  ;;  %vm904_vm1 = vcmp.eq.s32.totalorder %v1775_v17, 15  ;;  %vm905_vm2 = vcmp.eq.s32.totalorder %v1777_v18, 15 }
 0x170   : > { %v852_v16 = vmax.f32 %v842_v11, %v850_v13  ;;  %v853_v19 = vmax.f32 %v843_v12, %v851_v14  ;;  %v900_v31 = vsel %vm894_vm15, %v899_v34, -inf  ;;  %v901_v43 = vsel %vm895_vm0, %v899_v34, -inf }
 0x171   : > { %v910_v46 = vsel %vm904_vm1, %v909_v40, -inf  ;;  %v911_v48 = vsel %vm905_vm2, %v909_v40, -inf }
 0x172   : > { %v862_v24 = vmax.f32 %v852_v16, %v860_v20  ;;  %v863_v26 = vmax.f32 %v853_v19, %v861_v21 }
 0x174   : > { %v872_v30 = vmax.f32 %v862_v24, %v870_v23  ;;  %v873_v32 = vmax.f32 %v863_v26, %v871_v27 }
 0x176   : > { %v882_v37 = vmax.f32 %v872_v30, %v880_v25  ;;  %v883_v38 = vmax.f32 %v873_v32, %v881_v33 }
 0x178   : > { %v892_v41 = vmax.f32 %v882_v37, %v890_v29  ;;  %v893_v42 = vmax.f32 %v883_v38, %v891_v39 }
 0x17a   : > { %v902_v44 = vmax.f32 %v892_v41, %v900_v31  ;;  %v903_v45 = vmax.f32 %v893_v42, %v901_v43 }
 0x17c   : > { %v912_v49 = vmax.f32 %v902_v44, %v910_v46  ;;  %v913_v9 = vmax.f32 %v903_v45, %v911_v48 }
 0x17e   : > { %v1369_v51 = vpack.i.bf16 %v913_v9, %v912_v49 }
 0x180   : > { %1370 = vrot.lane.b32.xlu0 %v1369_v51, %s1555_s28 }
 0x1f2   : > { %v1371_v47 = vpop.permute.xlu0 %1370 }
 0x1f3   : > { %v1373_v50 = vunpack.i.h.bf16 %v1371_v47  ;;  %v1372_v52 = vunpack.i.l.bf16 %v1371_v47 }
 0x1f5   : > { %v919_v17 = vmax.f32 %v913_v9, %v1373_v50  ;;  %v918_v53 = vmax.f32 %v912_v49, %v1372_v52 }
 0x1f7   : > { %1299 = vmatprep.mubr.f32.mxu1 %v918_v53 }
 0x1f8   : > { %1300 = vmatmul.mubr.f32.vlgmr.msra.gmra.mxu1 %v919_v17 }
 0x2b8   : > { %v1301_v18 = vpop.f32.mrf.mxu1 }
 0x2b9   : > { %1012 = vst [vmem:[%s289_s15 + $0x8] sm:$0xf] %v1301_v18 }
 0x2ba   : > { %v1002_v54 = vpop.f32.mrf.mxu1 }
 0x2bb   : > { %1011 = vst [vmem:[%s289_s15] sm:$0xff] %v1002_v54 }
 0x2bc PF: > { %p15_p0 = scmp.ge.s32.totalorder %s1602_s19, 4   ;;  %s1895_s15 = smov %s1534_s16 }
 0x2bd   : > { %s1896_s16 = smov %s1538_s17  ;;  %s1897_s17 = smov %s1612_s22 }
 0x2be   : > { %s1898_s18 = smov %s1602_s19  ;;  %17 = sbr.rel (!%p15_p0) target bundleno = 4 (0x4), region = 94 }
 0x2c3   :  { %1034 = vsyncpa [#allocation3], 1 }
 0x2c4   :  { %1036 = vsyncpa [#allocation3 + $0x1], 1 }
 0x2c5   :  { %1037 = vsyncpa [#allocation5], 1 }

</bundles_post_ra>
